<compile_context>
chip_gen: v7x
topology: tpu7x:2x2x1
jax: 0.10.0
libtpu: 0.0.40
codegen_flags: <defaults>
</compile_context>

<pallas_src>
import math
import functools

import jax
import jax.numpy as jnp
from jax import lax
from jax.experimental import pallas as pl
from jax.experimental.pallas import tpu as pltpu


# -----------------------------------------------------------------------------
# Per-chip VMEM budget (v5e/v6e: 128 MiB physical, v7x: 64 MiB)
# -----------------------------------------------------------------------------
def _vmem_limit_bytes():
    try:
        cap = pltpu.get_tpu_info().vmem_capacity_bytes
    except Exception:
        cap = 64 * 1024 * 1024  # conservative fallback (v7x-sized)
    return (int(cap) * 3) // 4


# -----------------------------------------------------------------------------
# Tile-size helpers (divisor tiles; multiple of 8 / 128, or the full dim)
# -----------------------------------------------------------------------------
def _row_tile(n, pref=512, ensure_multi=True):
    """Largest multiple-of-8 divisor of n that is <= pref.  If ensure_multi,
    cap so the grid axis gets >= 2 steps when possible (v7x has 2 TCs)."""
    t = min(pref, n)
    t -= t % 8
    best = None
    while t >= 8:
        if n % t == 0:
            best = t
            break
        t -= 8
    if best is None:
        return n  # TODO(synk): cdiv + masked last tile for awkward n
    if ensure_multi and best == n and n >= 16:
        half = (n // 2) - ((n // 2) % 8)
        if half >= 8 and n % half == 0:
            best = half
    return best


def _col_tile(n, pref=512):
    t = min(pref, n)
    t -= t % 128
    while t >= 128:
        if n % t == 0:
            return t
        t -= 128
    return n


# -----------------------------------------------------------------------------
# Fused Q/K/V projection: one pallas_call, three MXU matmuls per row tile
# -----------------------------------------------------------------------------
def _fused_qkv_kernel(xq_ref, xk_ref, xv_ref,
                      wq_ref, wk_ref, wv_ref,
                      bq_ref, bk_ref, bv_ref,
                      q_ref, k_ref, v_ref):
    q_ref[...] = (jnp.dot(xq_ref[...], wq_ref[...],
                          preferred_element_type=jnp.float32)
                  + bq_ref[...]).astype(q_ref.dtype)
    k_ref[...] = (jnp.dot(xk_ref[...], wk_ref[...],
                          preferred_element_type=jnp.float32)
                  + bk_ref[...]).astype(k_ref.dtype)
    v_ref[...] = (jnp.dot(xv_ref[...], wv_ref[...],
                          preferred_element_type=jnp.float32)
                  + bv_ref[...]).astype(v_ref.dtype)


def fused_qkv_projection(xq, xk, xv, wq, bq, wk, bk, wv, bv,
                         *, compute_dtype, out_dtype):
    """xq/xk/xv: (N, d_model) with identical N; returns (q, k, v) 2-D."""
    N, d_model = xq.shape
    dq, dk, dv = wq.shape[1], wk.shape[1], wv.shape[1]
    tm = _row_tile(N)

    # One wrapper-level cast: feeds the MXU its native bf16 and halves the HBM
    # read traffic of activations and weights (biases stay f32; f32-accumulate).
    xq = xq.astype(compute_dtype)
    xk = xk.astype(compute_dtype)
    xv = xv.astype(compute_dtype)
    wq = wq.astype(compute_dtype)
    wk = wk.astype(compute_dtype)
    wv = wv.astype(compute_dtype)

    def full(shape):
        return pl.BlockSpec(shape, lambda i: (0, 0))

    def row(d):
        return pl.BlockSpec((tm, d), lambda i: (i, 0))

    return pl.pallas_call(
        _fused_qkv_kernel,
        out_shape=(jax.ShapeDtypeStruct((N, dq), out_dtype),
                   jax.ShapeDtypeStruct((N, dk), out_dtype),
                   jax.ShapeDtypeStruct((N, dv), out_dtype)),
        grid=(N // tm,),
        in_specs=[row(d_model), row(d_model), row(d_model),
                  full((d_model, dq)), full((d_model, dk)), full((d_model, dv)),
                  full((1, dq)), full((1, dk)), full((1, dv))],
        out_specs=(row(dq), row(dk), row(dv)),
        compiler_params=pltpu.CompilerParams(
            dimension_semantics=("parallel",),
            vmem_limit_bytes=_vmem_limit_bytes()),
    )(xq, xk, xv, wq, wk, wv, bq, bk, bv)


# -----------------------------------------------------------------------------
# Generic tiled linear (used for the out-projection and the L != S fallback)
# -----------------------------------------------------------------------------
def _linear_kernel(x_ref, w_ref, b_ref, o_ref):
    o_ref[...] = (jnp.dot(x_ref[...], w_ref[...],
                          preferred_element_type=jnp.float32)
                  + b_ref[...]).astype(o_ref.dtype)


def pallas_linear(x2d, w, b, *, compute_dtype, out_dtype):
    """x2d: (N, d_in), w: (d_in, d_out), b: (1, d_out)."""
    N, d_in = x2d.shape
    d_out = w.shape[1]
    tm = _row_tile(N)
    tn = _col_tile(d_out)
    x2d = x2d.astype(compute_dtype)
    w = w.astype(compute_dtype)
    return pl.pallas_call(
        _linear_kernel,
        out_shape=jax.ShapeDtypeStruct((N, d_out), out_dtype),
        grid=(N // tm, d_out // tn),
        in_specs=[
            pl.BlockSpec((tm, d_in), lambda i, j: (i, 0)),
            pl.BlockSpec((d_in, tn), lambda i, j: (0, j)),
            pl.BlockSpec((1, tn), lambda i, j: (0, j)),
        ],
        out_specs=pl.BlockSpec((tm, tn), lambda i, j: (i, j)),
        compiler_params=pltpu.CompilerParams(
            dimension_semantics=("parallel", "parallel"),
            vmem_limit_bytes=_vmem_limit_bytes()),
    )(x2d, w, b)


# -----------------------------------------------------------------------------
# Attention kernels (head-major layout: one head per grid step)
# -----------------------------------------------------------------------------
def _flash_attn_kernel(q_ref, k_ref, v_ref, o_ref, m_sc, l_sc, acc_sc,
                       *, scale, compute_dtype):
    """Online-softmax over S tiles.  q_ref: (1,tl,E), k_ref: (1,ts,E),
    v_ref: (1,ts,Dv), o_ref: (1,tl,Dv)."""
    s_idx = pl.program_id(2)

    @pl.when(s_idx == 0)
    def _():
        m_sc[...] = jnp.full_like(m_sc, -jnp.inf)
        l_sc[...] = jnp.zeros_like(l_sc)
        acc_sc[...] = jnp.zeros_like(acc_sc)

    # scale folded into q (tl x E) instead of the (tl x ts) scores
    q = (q_ref[0].astype(jnp.float32) * scale).astype(compute_dtype)
    k = k_ref[0].astype(compute_dtype)
    v = v_ref[0].astype(compute_dtype)

    # contract the shared E axis directly (q @ k.T without materializing k.T)
    s = lax.dot_general(q, k, (((1,), (1,)), ((), ())),
                        preferred_element_type=jnp.float32)   # (tl, ts) f32

    m_prev = m_sc[...]
    m_new = jnp.maximum(m_prev, jnp.max(s, axis=-1, keepdims=True))
    alpha = jnp.exp(m_prev - m_new)
    p = jnp.exp(s - m_new)
    l_sc[...] = alpha * l_sc[...] + jnp.sum(p, axis=-1, keepdims=True)
    acc_sc[...] = alpha * acc_sc[...] + jnp.dot(
        p.astype(compute_dtype), v, preferred_element_type=jnp.float32)
    m_sc[...] = m_new

    @pl.when(s_idx == pl.num_programs(2) - 1)
    def _():
        o_ref[0] = (acc_sc[...] *
                    pl.reciprocal(l_sc[...], approx=True)).astype(o_ref.dtype)


def _attn_full_kernel(q_ref, k_ref, v_ref, o_ref, a_ref, *, scale, compute_dtype):
    """Full-S softmax; also writes the attention weights (exact normalization)."""
    q = (q_ref[0].astype(jnp.float32) * scale).astype(compute_dtype)
    k = k_ref[0].astype(compute_dtype)
    v = v_ref[0].astype(compute_dtype)
    s = lax.dot_general(q, k, (((1,), (1,)), ((), ())),
                        preferred_element_type=jnp.float32)   # (tl, S) f32
    m = jnp.max(s, axis=-1, keepdims=True)
    p = jnp.exp(s - m)
    denom = jnp.sum(p, axis=-1, keepdims=True)
    attn = p / denom        # exact normalization: these weights are exported
    o_ref[0] = jnp.dot(attn.astype(compute_dtype), v,
                       preferred_element_type=jnp.float32).astype(o_ref.dtype)
    a_ref[0] = attn.astype(a_ref.dtype)


def pallas_attention(q3, k3, v3, *, output_attn, compute_dtype,
                     attn_dtype=jnp.float32):
    """q3: (B*H, L, E); k3: (B*H, S, E); v3: (B*H, S, Dv), head-major layout."""
    BH, L, E = q3.shape
    _, S, Dv = v3.shape
    scale = 1.0 / math.sqrt(E)
    vmem = _vmem_limit_bytes()

    if output_attn:
        # TODO(synk): tile the S axis of the exported weights (and/or emit them
        # in bf16) for long-sequence / v7x use.
        tl = _row_tile(L, pref=256)
        kern = functools.partial(_attn_full_kernel, scale=scale,
                                 compute_dtype=compute_dtype)
        out3, attn = pl.pallas_call(
            kern,
            out_shape=(jax.ShapeDtypeStruct((BH, L, Dv), q3.dtype),
                       jax.ShapeDtypeStruct((BH, L, S), attn_dtype)),
            grid=(BH, L // tl),
            in_specs=[pl.BlockSpec((1, tl, E), lambda b, l: (b, l, 0)),
                      pl.BlockSpec((1, S, E), lambda b, l: (b, 0, 0)),
                      pl.BlockSpec((1, S, Dv), lambda b, l: (b, 0, 0))],
            out_specs=(pl.BlockSpec((1, tl, Dv), lambda b, l: (b, l, 0)),
                       pl.BlockSpec((1, tl, S), lambda b, l: (b, l, 0))),
            compiler_params=pltpu.CompilerParams(
                dimension_semantics=("parallel", "parallel"),
                vmem_limit_bytes=vmem),
        )(q3, k3, v3)
        return out3, attn

    tl = _row_tile(L, pref=512)
    ts = _row_tile(S, pref=512, ensure_multi=False)
    kern = functools.partial(_flash_attn_kernel, scale=scale,
                             compute_dtype=compute_dtype)
    out3 = pl.pallas_call(
        kern,
        out_shape=jax.ShapeDtypeStruct((BH, L, Dv), q3.dtype),
        grid=(BH, L // tl, S // ts),
        in_specs=[pl.BlockSpec((1, tl, E), lambda b, l, s: (b, l, 0)),
                  pl.BlockSpec((1, ts, E), lambda b, l, s: (b, s, 0)),
                  pl.BlockSpec((1, ts, Dv), lambda b, l, s: (b, s, 0))],
        out_specs=pl.BlockSpec((1, tl, Dv), lambda b, l, s: (b, l, 0)),
        scratch_shapes=[pltpu.VMEM((tl, 1), jnp.float32),
                        pltpu.VMEM((tl, 1), jnp.float32),
                        pltpu.VMEM((tl, Dv), jnp.float32)],
        compiler_params=pltpu.CompilerParams(
            dimension_semantics=("parallel", "parallel", "arbitrary"),
            vmem_limit_bytes=vmem),
    )(q3, k3, v3)
    return out3, None


# -----------------------------------------------------------------------------
# AttentionLayer forward (glue in plain JAX; all matmuls / softmax in Pallas)
# -----------------------------------------------------------------------------
def init_params(key, d_model, d_qk, d_v, n_heads):
    ks = jax.random.split(key, 8)

    def lin(kw, kb, fan_in, fan_out):
        bound = 1.0 / math.sqrt(fan_in)
        w = jax.random.uniform(kw, (fan_in, fan_out), jnp.float32, -bound, bound)
        b = jax.random.uniform(kb, (1, fan_out), jnp.float32, -bound, bound)
        return w, b

    return {
        "q": lin(ks[0], ks[1], d_model, d_qk * n_heads),
        "k": lin(ks[2], ks[3], d_model, d_qk * n_heads),
        "v": lin(ks[4], ks[5], d_model, d_v * n_heads),
        "o": lin(ks[6], ks[7], d_v * n_heads, d_model),
    }


def attention_layer_forward(params, queries, keys, values, n_heads,
                            output_attn=False, compute_dtype=jnp.bfloat16):
    B, L, d_model = queries.shape
    _, S, _ = keys.shape
    H = n_heads
    out_dtype = queries.dtype

    xq = queries.reshape(B * L, d_model)
    xk = keys.reshape(B * S, d_model)
    xv = values.reshape(B * S, d_model)

    # Q/K/V projections (dropout_qkv p=0.0 -> identity).  Fused into one
    # pallas_call when the row counts match.
    if L == S:
        q2, k2, v2 = fused_qkv_projection(
            xq, xk, xv, *params["q"], *params["k"], *params["v"],
            compute_dtype=compute_dtype, out_dtype=compute_dtype)
    else:
        q2 = pallas_linear(xq, *params["q"], compute_dtype=compute_dtype,
                           out_dtype=compute_dtype)
        k2 = pallas_linear(xk, *params["k"], compute_dtype=compute_dtype,
                           out_dtype=compute_dtype)
        v2 = pallas_linear(xv, *params["v"], compute_dtype=compute_dtype,
                           out_dtype=compute_dtype)

    E = q2.shape[1] // H
    Dv = v2.shape[1] // H

    # Head-major layout (one XLA transpose per tensor): each attention grid
    # step then sees contiguous 2-D per-head tiles, replacing H strided VMEM
    # slices / relayouts per grid step inside the kernel.
    q3 = q2.reshape(B, L, H, E).transpose(0, 2, 1, 3).reshape(B * H, L, E)
    k3 = k2.reshape(B, S, H, E).transpose(0, 2, 1, 3).reshape(B * H, S, E)
    v3 = v2.reshape(B, S, H, Dv).transpose(0, 2, 1, 3).reshape(B * H, S, Dv)

    out3, attn = pallas_attention(q3, k3, v3, output_attn=output_attn,
                                  compute_dtype=compute_dtype)

    out2 = (out3.reshape(B, H, L, Dv).transpose(0, 2, 1, 3)
            .reshape(B * L, H * Dv))
    out = pallas_linear(out2, *params["o"], compute_dtype=compute_dtype,
                        out_dtype=out_dtype)
    out = out.reshape(B, L, d_model)
    if output_attn:
        attn = attn.reshape(B, H, L, S)
    return out, attn


# -----------------------------------------------------------------------------
# Pure-JAX reference for validation
# -----------------------------------------------------------------------------
def reference_forward(params, queries, keys, values, n_heads):
    B, L, d_model = queries.shape
    _, S, _ = keys.shape
    H = n_heads

    def lin(x, w, b):
        return x @ w + b

    q = lin(queries, *params["q"]).reshape(B, L, H, -1)
    k = lin(keys, *params["k"]).reshape(B, S, H, -1)
    v = lin(values, *params["v"]).reshape(B, S, H, -1)
    E = q.shape[-1]
    scale = 1.0 / math.sqrt(E)
    scores = jnp.einsum("blhe,bshe->bhls", q, k) * scale
    attn = jax.nn.softmax(scores, axis=-1)
    out = jnp.einsum("bhls,bshd->blhd", attn, v).reshape(B, L, -1)
    out = lin(out, *params["o"])
    return out, attn


# -----------------------------------------------------------------------------
if __name__ == "__main__":
    def check(B, L, S, d_model, d_qk, d_v, n_heads, compute_dtype,
              output_attn, rtol, atol):
        root = jax.random.PRNGKey(0)
        kp, kq, kk, kv = jax.random.split(root, 4)
        params = init_params(kp, d_model, d_qk, d_v, n_heads)
        queries = jax.random.normal(kq, (B, L, d_model), jnp.float32)
        keys = jax.random.normal(kk, (B, S, d_model), jnp.float32)
        values = jax.random.normal(kv, (B, S, d_model), jnp.float32)

        out, attn = attention_layer_forward(
            params, queries, keys, values, n_heads,
            output_attn=output_attn, compute_dtype=compute_dtype)
        out = jax.block_until_ready(out)

        ref_out, ref_attn = reference_forward(params, queries, keys, values, n_heads)
        assert out.shape == (B, L, d_model)
        assert jnp.allclose(out, ref_out, rtol=rtol, atol=atol), (
            f"out mismatch dtype={compute_dtype} output_attn={output_attn} "
            f"shape=({B},{L},{S},{d_model})")
        if output_attn:
            attn = jax.block_until_ready(attn)
            assert attn.shape == (B, n_heads, L, S)
            assert jnp.allclose(attn, ref_attn, rtol=rtol, atol=atol), (
                f"attn mismatch dtype={compute_dtype}")
        else:
            assert attn is None

    # Small shapes (both compute modes, both attention paths).
    small = dict(B=2, L=8, S=8, d_model=32, d_qk=8, d_v=8, n_heads=4)
    check(**small, compute_dtype=jnp.float32, output_attn=True, rtol=5e-3, atol=5e-3)
    check(**small, compute_dtype=jnp.float32, output_attn=False, rtol=5e-3, atol=5e-3)
    check(**small, compute_dtype=jnp.bfloat16, output_attn=True, rtol=5e-2, atol=5e-2)
    check(**small, compute_dtype=jnp.bfloat16, output_attn=False, rtol=5e-2, atol=5e-2)

    # Larger shapes: exercises multi-tile grids and the (8,128)-aligned
    # block paths (flash S-tiling, tl=ts=128, multiple parallel grid steps).
    medium = dict(B=2, L=256, S=256, d_model=128, d_qk=32, d_v=32, n_heads=4)
    check(**medium, compute_dtype=jnp.bfloat16, output_attn=False, rtol=5e-2, atol=5e-2)
    check(**medium, compute_dtype=jnp.float32, output_attn=True, rtol=5e-3, atol=5e-3)

    print("KERNEL_OK")
</pallas_src>

<mosaic_0001>
module attributes {stable_mosaic.version = 11 : i64} {
  func.func @_fused_qkv_kernel(%arg0: i32, %arg1: memref<8x32xf32, #tpu.memory_space<vmem>>, %arg2: memref<8x32xf32, #tpu.memory_space<vmem>>, %arg3: memref<8x32xf32, #tpu.memory_space<vmem>>, %arg4: memref<32x32xf32, #tpu.memory_space<vmem>>, %arg5: memref<32x32xf32, #tpu.memory_space<vmem>>, %arg6: memref<32x32xf32, #tpu.memory_space<vmem>>, %arg7: memref<1x32xf32, #tpu.memory_space<vmem>>, %arg8: memref<1x32xf32, #tpu.memory_space<vmem>>, %arg9: memref<1x32xf32, #tpu.memory_space<vmem>>, %arg10: memref<8x32xf32, #tpu.memory_space<vmem>>, %arg11: memref<8x32xf32, #tpu.memory_space<vmem>>, %arg12: memref<8x32xf32, #tpu.memory_space<vmem>>) attributes {dimension_semantics = [#tpu.dimension_semantics<parallel>], iteration_bounds = array<i64: 2>, scalar_prefetch = 0 : i64, scratch_operands = 0 : i64, tpu.core_type = #tpu.core_type<tc>, window_params = [{transform_indices = @transform_0, window_bounds = array<i64: 8, 32>}, {transform_indices = @transform_1, window_bounds = array<i64: 8, 32>}, {transform_indices = @transform_2, window_bounds = array<i64: 8, 32>}, {pipeline_mode = #tpu.pipeline_mode<synchronous>, transform_indices = @transform_3, window_bounds = array<i64: 32, 32>}, {pipeline_mode = #tpu.pipeline_mode<synchronous>, transform_indices = @transform_4, window_bounds = array<i64: 32, 32>}, {pipeline_mode = #tpu.pipeline_mode<synchronous>, transform_indices = @transform_5, window_bounds = array<i64: 32, 32>}, {pipeline_mode = #tpu.pipeline_mode<synchronous>, transform_indices = @transform_6, window_bounds = array<i64: 1, 32>}, {pipeline_mode = #tpu.pipeline_mode<synchronous>, transform_indices = @transform_7, window_bounds = array<i64: 1, 32>}, {pipeline_mode = #tpu.pipeline_mode<synchronous>, transform_indices = @transform_8, window_bounds = array<i64: 1, 32>}, {transform_indices = @transform_9, window_bounds = array<i64: 8, 32>}, {transform_indices = @transform_10, window_bounds = array<i64: 8, 32>}, {transform_indices = @transform_11, window_bounds = array<i64: 8, 32>}]} {
    %c0 = arith.constant 0 : index
    %c0_0 = arith.constant 0 : index
    %0 = vector.load %arg1[%c0, %c0_0] : memref<8x32xf32, #tpu.memory_space<vmem>>, vector<8x32xf32>
    %c0_1 = arith.constant 0 : index
    %c0_2 = arith.constant 0 : index
    %1 = vector.load %arg4[%c0_1, %c0_2] : memref<32x32xf32, #tpu.memory_space<vmem>>, vector<32x32xf32>
    %cst = arith.constant dense<0.000000e+00> : vector<8x32xf32>
    %2 = tpu.matmul %0, %1, %cst {dimension_numbers = #tpu.dot_dimension_numbers<[1], [0], [0], [1], [0, 0, 1, 1], [], []>} : vector<8x32xf32>, vector<32x32xf32>, vector<8x32xf32> -> vector<8x32xf32>
    %c0_3 = arith.constant 0 : index
    %c0_4 = arith.constant 0 : index
    %3 = vector.load %arg7[%c0_3, %c0_4] : memref<1x32xf32, #tpu.memory_space<vmem>>, vector<1x32xf32>
    %4 = vector.broadcast %3 : vector<1x32xf32> to vector<8x32xf32>
    %5 = arith.addf %2, %4 : vector<8x32xf32>
    %c0_5 = arith.constant 0 : index
    %c0_6 = arith.constant 0 : index
    %6 = vector.load %arg10[%c0_5, %c0_6] : memref<8x32xf32, #tpu.memory_space<vmem>>, vector<8x32xf32>
    tpu.vector_store %arg10[%c0_5, %c0_6], %5 {strides = array<i32>} : memref<8x32xf32, #tpu.memory_space<vmem>>, vector<8x32xf32>,
    %c0_7 = arith.constant 0 : index
    %c0_8 = arith.constant 0 : index
    %7 = vector.load %arg2[%c0_7, %c0_8] : memref<8x32xf32, #tpu.memory_space<vmem>>, vector<8x32xf32>
    %c0_9 = arith.constant 0 : index
    %c0_10 = arith.constant 0 : index
    %8 = vector.load %arg5[%c0_9, %c0_10] : memref<32x32xf32, #tpu.memory_space<vmem>>, vector<32x32xf32>
    %cst_11 = arith.constant dense<0.000000e+00> : vector<8x32xf32>
    %9 = tpu.matmul %7, %8, %cst_11 {dimension_numbers = #tpu.dot_dimension_numbers<[1], [0], [0], [1], [0, 0, 1, 1], [], []>} : vector<8x32xf32>, vector<32x32xf32>, vector<8x32xf32> -> vector<8x32xf32>
    %c0_12 = arith.constant 0 : index
    %c0_13 = arith.constant 0 : index
    %10 = vector.load %arg8[%c0_12, %c0_13] : memref<1x32xf32, #tpu.memory_space<vmem>>, vector<1x32xf32>
    %11 = vector.broadcast %10 : vector<1x32xf32> to vector<8x32xf32>
    %12 = arith.addf %9, %11 : vector<8x32xf32>
    %c0_14 = arith.constant 0 : index
    %c0_15 = arith.constant 0 : index
    %13 = vector.load %arg11[%c0_14, %c0_15] : memref<8x32xf32, #tpu.memory_space<vmem>>, vector<8x32xf32>
    tpu.vector_store %arg11[%c0_14, %c0_15], %12 {strides = array<i32>} : memref<8x32xf32, #tpu.memory_space<vmem>>, vector<8x32xf32>,
    %c0_16 = arith.constant 0 : index
    %c0_17 = arith.constant 0 : index
    %14 = vector.load %arg3[%c0_16, %c0_17] : memref<8x32xf32, #tpu.memory_space<vmem>>, vector<8x32xf32>
    %c0_18 = arith.constant 0 : index
    %c0_19 = arith.constant 0 : index
    %15 = vector.load %arg6[%c0_18, %c0_19] : memref<32x32xf32, #tpu.memory_space<vmem>>, vector<32x32xf32>
    %cst_20 = arith.constant dense<0.000000e+00> : vector<8x32xf32>
    %16 = tpu.matmul %14, %15, %cst_20 {dimension_numbers = #tpu.dot_dimension_numbers<[1], [0], [0], [1], [0, 0, 1, 1], [], []>} : vector<8x32xf32>, vector<32x32xf32>, vector<8x32xf32> -> vector<8x32xf32>
    %c0_21 = arith.constant 0 : index
    %c0_22 = arith.constant 0 : index
    %17 = vector.load %arg9[%c0_21, %c0_22] : memref<1x32xf32, #tpu.memory_space<vmem>>, vector<1x32xf32>
    %18 = vector.broadcast %17 : vector<1x32xf32> to vector<8x32xf32>
    %19 = arith.addf %16, %18 : vector<8x32xf32>
    %c0_23 = arith.constant 0 : index
    %c0_24 = arith.constant 0 : index
    %20 = vector.load %arg12[%c0_23, %c0_24] : memref<8x32xf32, #tpu.memory_space<vmem>>, vector<8x32xf32>
    tpu.vector_store %arg12[%c0_23, %c0_24], %19 {strides = array<i32>} : memref<8x32xf32, #tpu.memory_space<vmem>>, vector<8x32xf32>,
    return
  }
  func.func @transform_0(%arg0: i32) -> (i32, i32) {
    %c0_i32 = arith.constant 0 : i32
    %c0_i32_0 = arith.constant 0 : i32
    return %arg0, %c0_i32 : i32, i32
  }
  func.func @transform_1(%arg0: i32) -> (i32, i32) {
    %c0_i32 = arith.constant 0 : i32
    %c0_i32_0 = arith.constant 0 : i32
    return %arg0, %c0_i32 : i32, i32
  }
  func.func @transform_2(%arg0: i32) -> (i32, i32) {
    %c0_i32 = arith.constant 0 : i32
    %c0_i32_0 = arith.constant 0 : i32
    return %arg0, %c0_i32 : i32, i32
  }
  func.func @transform_3(%arg0: i32) -> (i32, i32) {
    %c0_i32 = arith.constant 0 : i32
    %c0_i32_0 = arith.constant 0 : i32
    %c0_i32_1 = arith.constant 0 : i32
    return %c0_i32, %c0_i32_0 : i32, i32
  }
  func.func @transform_4(%arg0: i32) -> (i32, i32) {
    %c0_i32 = arith.constant 0 : i32
    %c0_i32_0 = arith.constant 0 : i32
    %c0_i32_1 = arith.constant 0 : i32
    return %c0_i32, %c0_i32_0 : i32, i32
  }
  func.func @transform_5(%arg0: i32) -> (i32, i32) {
    %c0_i32 = arith.constant 0 : i32
    %c0_i32_0 = arith.constant 0 : i32
    %c0_i32_1 = arith.constant 0 : i32
    return %c0_i32, %c0_i32_0 : i32, i32
  }
  func.func @transform_6(%arg0: i32) -> (i32, i32) {
    %c0_i32 = arith.constant 0 : i32
    %c0_i32_0 = arith.constant 0 : i32
    %c0_i32_1 = arith.constant 0 : i32
    return %c0_i32, %c0_i32_0 : i32, i32
  }
  func.func @transform_7(%arg0: i32) -> (i32, i32) {
    %c0_i32 = arith.constant 0 : i32
    %c0_i32_0 = arith.constant 0 : i32
    %c0_i32_1 = arith.constant 0 : i32
    return %c0_i32, %c0_i32_0 : i32, i32
  }
  func.func @transform_8(%arg0: i32) -> (i32, i32) {
    %c0_i32 = arith.constant 0 : i32
    %c0_i32_0 = arith.constant 0 : i32
    %c0_i32_1 = arith.constant 0 : i32
    return %c0_i32, %c0_i32_0 : i32, i32
  }
  func.func @transform_9(%arg0: i32) -> (i32, i32) {
    %c0_i32 = arith.constant 0 : i32
    %c0_i32_0 = arith.constant 0 : i32
    return %arg0, %c0_i32 : i32, i32
  }
  func.func @transform_10(%arg0: i32) -> (i32, i32) {
    %c0_i32 = arith.constant 0 : i32
    %c0_i32_0 = arith.constant 0 : i32
    return %arg0, %c0_i32 : i32, i32
  }
  func.func @transform_11(%arg0: i32) -> (i32, i32) {
    %c0_i32 = arith.constant 0 : i32
    %c0_i32_0 = arith.constant 0 : i32
    return %arg0, %c0_i32 : i32, i32
  }
}

</mosaic_0001>

<bundles_post_ra>
// kernel: tpu_custom_call.1
= control target key start
LH: loop header
LB: loop body
LE: loop exit
PB: predicated region body
PF: predicated region fallthrough
CT: control target
= control target key end

     0   :  { %s2067_s0 = inlined_call_operand.hbm [shape: f32[16,32], index: 0, kind: input, shape index: {}]   ;;  %s2068_s1 = inlined_call_operand.hbm [shape: f32[16,32], index: 1, kind: input, shape index: {}]   ;;  %s2069_s2 = inlined_call_operand.hbm [shape: f32[16,32], index: 2, kind: input, shape index: {}]   ;;  %s2070_s3 = inlined_call_operand.hbm [shape: f32[32,32], index: 3, kind: input, shape index: {}]   ;;  %s2071_s4 = inlined_call_operand.hbm [shape: f32[32,32], index: 4, kind: input, shape index: {}]   ;;  %s2072_s5 = inlined_call_operand.hbm [shape: f32[32,32], index: 5, kind: input, shape index: {}]   ;;  %s2073_s6 = inlined_call_operand.vmem [shape: f32[1,32], index: 6, kind: input, shape index: {}]   ;;  %s2074_s7 = inlined_call_operand.vmem [shape: f32[1,32], index: 7, kind: input, shape index: {}]   ;;  %s2075_s8 = inlined_call_operand.vmem [shape: f32[1,32], index: 8, kind: input, shape index: {}]   ;;  %s2076_s9 = inlined_call_operand.hbm [shape: f32[16,32], index: 9, kind: output, shape index: {0}]   ;;  %s2077_s10 = inlined_call_operand.hbm [shape: f32[16,32], index: 10, kind: output, shape index: {1}]   ;;  %s2078_s11 = inlined_call_operand.hbm [shape: f32[16,32], index: 11, kind: output, shape index: {2}]  }
   0x1   :  { %2108 = sst [smem:[#allocation29_spill]] %s2068_s1 }
   0x2   :  { %2109 = sst [smem:[#allocation30_spill]] %s2070_s3 }
   0x3   :  { %2110 = sst [smem:[#allocation31_spill]] %s2075_s8 }
   0x4   :  { %2111 = sst [smem:[#allocation32_spill]] %s2076_s9 }
   0x5   :  { %2112 = sst [smem:[#allocation33_spill]] %s2077_s10 }
   0x6   :  { %2113 = sst [smem:[#allocation34_spill]] %s2078_s11 }
   0x7   :  { %17 = vsyncpa [#allocation3], 0 }
   0x8   :  { %19 = vsyncpa [#allocation3 + $0x1], 0 }
   0x9   :  { %20 = vsyncpa [#allocation6], 0 }
   0xa   :  { %22 = vsyncpa [#allocation6 + $0x1], 0 }
   0xb   :  { %23 = vsyncpa [#allocation9], 0 }
   0xc   :  { %24 = vsyncpa [#allocation12], 0 }
   0xd   :  { %25 = vsyncpa [#allocation4], 0 }
   0xe   :  { %27 = vsyncpa [#allocation4 + $0x1], 0 }
   0xf   :  { %28 = vsyncpa [#allocation15], 0 }
  0x10   :  { %30 = vsyncpa [#allocation15 + $0x1], 0  ;;  %s1639_s17 = smov 0   ;;  %s1641_s18 = smov 0  }
  0x11   :  { %s1643_s19 = smov 0   ;;  %s1645_s20 = smov 0  }
  0x12 LB: > { %2114 = sst [smem:[#allocation23_spill]] %s1551_s17  ;;  %s1660_s21 = sadd.s32 4294967295, %s1563_s20   ;;  %s1563_s20 = sphi %s1645_s20, %s2157_s20   ;;  %s1559_s19 = sphi %s1643_s19, %s2161_s19   ;;  %s1555_s18 = sphi %s1641_s18, %s2160_s18   ;;  %s1551_s17 = sphi %s1639_s17, %s2159_s17  }
  0x13   : > { %2115 = sst [smem:[#allocation24_spill]] %s1563_s20  ;;  %s2079_s22 = sadd.s32 4294967294, %s1563_s20  }
  0x14   : > { %p56_p0 = scmp.ne.s32.totalorder %s1555_s18, %s1551_s17  ;;  %p2082_p1 = scmp.eq.s32.totalorder %s1660_s21, 0 }
  0x15   : > { %p264_p3 = scmp.eq.s32.totalorder %s2079_s22, 1  ;;  %p1048_p5 = scmp.ge.s32.totalorder %s1563_s20, 1 }
  0x16   : > { %p1671_p4 = por %p2082_p1, %p56_p0  ;;  %p323_p7 = scmp.lt.s32.totalorder %s1563_s20, 3 }
  0x17   : > { %p1676_p6 = por %p264_p3, %p56_p0  ;;  %s1565_s26 = smov [#allocation8]  }
  0x18   : > { %s2116_s23 = scalar_select %p1671_p4, 1, 0 }
  0x19   : > { %s2117_s24 = scalar_select %p1676_p6, 1, 0 }
  0x1a   : > { %p1681_p8 = pnand %p1048_p5, %p323_p7  ;;  %s335_s27 = sshll.u32 %s1565_s26, 4  ;;  %s1685_s27 = int_to_ptr.vmem [resolvable:$true] %s335_s27 }
  0x1b   : > { %2118 = sst [smem:[#allocation25_spill]] %s2117_s24  ;;  %s1697_s29 = sadd.s32 1, %s1563_s20  }
  0x1c   : > { %s2119_s25 = scalar_select %p1681_p8, 1, 0 }
  0x1d   : > { %p1173_p9 = pneg %p1681_p8  ;;  %2121 = sst [smem:[#allocation26_spill]] %s1697_s29 }
  0x1e   : > { %s43_s30 = sadd.s32 1, %s1559_s19  ;;  %s40_s12 = ssub.s32 %s1563_s20, %s1697_s29 }
  0x1f   : > { %p1692_p11 = pnand %p1173_p9, %p2082_p1  ;;  %s2122_s3 = sld [smem:[#allocation30_spill]] }
  0x21   : > { %s2120_s28 = scalar_select %p1692_p11, 1, 0 }
  0x22   : > { %p1710_p13 = pneg %p1692_p11 }
  0x24   : > { %s2123_s22 = scalar_select %p1710_p13, 1, 0 }
  0x25   : > { %s1251_s15 = scalar_lea.hbm %s2122_s3, 512 }
  0x26   : > { %p1252_p12 = scmp.ne.s32.totalorder %s2122_s3, %s1251_s15  ;;  %p1258_p5 = scmp.lt.u32.totalorder %s1251_s15, %s2122_s3 }
  0x28   : > { %p1254_p0 = pnand %p1710_p13, %p1252_p12 }
  0x2a   : > { %p1255_p3 = pneg %p1254_p0 }
  0x2c   : > { %p1260_p7 = pnand %p1258_p5, %p1255_p3 }
  0x2e   : > { %1263 = shalt.err (!%p1260_p7)
}
  0x2f   : > { %s1264_s13 = scalar_lea.vmem %s1685_s27, 512  ;;  %p1272_p2 = scmp.lt.s32.totalorder %s1685_s27, %s1685_s27 }
  0x30   : > { %p1265_p9 = scmp.ne.s32.totalorder %s1685_s27, %s1264_s13  ;;  %p1273_p6 = scmp.lt.s32.totalorder %s1264_s13, %s1264_s13 }
  0x32   : > { %p1267_p10 = pnand %p1265_p9, %p1710_p13  ;;  %p1274_p12 = por %p1273_p6, %p1272_p2 }
  0x34   : > { %p1268_p1 = pneg %p1267_p10 }
  0x36   : > { %p1275_p0 = pnand %p1274_p12, %p1268_p1 }
  0x38   : > { %1278 = shalt.err (!%p1275_p0)
}
  0x39   : > { %s2086_s14 = smov 128   ;;  %s2088_s17 = smov 8  }
  0x3a   : > { %1176 = dma.hbm_to_vmem [thread:$0]  (!%p1692_p11), %s2122_s3, 512, %s1685_s27, [#allocation9], %s2086_s14, %s2086_s14, %s2088_s17  }
  0x3b   : > { %p41_p1 = scmp.eq.s32.totalorder %s40_s12, 0  ;;  %p50_p2 = scmp.ne.s32.totalorder %s1559_s19, %s1555_s18 }
  0x3c   : > { %p51_p6 = scmp.eq.s32.totalorder %s1563_s20, 0  ;;  %p1206_p10 = scmp.lt.s32.totalorder %s1563_s20, 2 }
  0x3d   : > { %s1739_s16 = scalar_select %p41_p1, %s1559_s19, %s43_s30  }
  0x3e   : > { %p52_p3 = por %p51_p6, %p50_p2  ;;  %p2125_p5 = scmp.eq.s32.totalorder %s1660_s21, 1 }
  0x3f   : > { %2124 = sst [smem:[#allocation27_spill]] %s1739_s16  ;;  %s2090_s13 = sand.u32 1, %s1559_s19  }
  0x40   : > { %p1743_p7 = por %p2125_p5, %p50_p2  ;;  %s1749_s29 = sshll.u32 %s1563_s20, 7 }
  0x41   : > { %s1753_s11 = sshll.u32 %s2090_s13, 3  ;;  %p1755_p9 = pnand %p1206_p10, %p52_p3 }
  0x42   : > { %s2126_s26 = scalar_select %p1743_p7, 1, 0 }
  0x43   : > { %s2128_s27 = scalar_select %p1755_p9, 1, 0 }
  0x44   : > { %2127 = sst [smem:[#allocation28_spill]] %s2126_s26  ;;  %s402_s30 = sand.u32 1, %s1563_s20  }
  0x45   : > { %s2129_s1 = sld [smem:[#allocation29_spill]]  ;;  %s406_s14 = scalar_lea.vmem [#allocation5], %s1753_s11 }
  0x46   : > { %s413_s17 = sshll.u32 %s406_s14, 4  ;;  %s1769_s13 = scalar_lea.sflag [#allocation6], %s402_s30  ;;  %s1767_s17 = int_to_ptr.vmem [resolvable:$true] %s413_s17 }
  0x47   : > { %p1775_p0 = pneg %p1755_p9 }
  0x49   : > { %s2130_s16 = scalar_select %p1775_p0, 1, 0 }
  0x4b   : > { %s1764_s15 = scalar_lea.hbm %s2129_s1, %s1749_s29  ;;  %s1284_s20 = scalar_lea.hbm %s2129_s1, 256 }
  0x4c   : > { %s1279_s3 = scalar_lea.hbm %s1764_s15, 128  ;;  %p1285_p6 = scmp.lt.u32.totalorder %s1764_s15, %s2129_s1 }
  0x4d   : > { %p1280_p12 = scmp.ne.s32.totalorder %s1764_s15, %s1279_s3  ;;  %p1286_p10 = scmp.lt.u32.totalorder %s1284_s20, %s1279_s3 }
  0x4e   : > { %p1288_p5 = scmp.lt.u32.totalorder %s1279_s3, %s1764_s15 }
  0x4f   : > { %p1282_p1 = pnand %p1775_p0, %p1280_p12  ;;  %p1287_p3 = por %p1286_p10, %p1285_p6 }
  0x51   : > { %p1283_p2 = pneg %p1282_p1  ;;  %p1289_p7 = por %p1288_p5, %p1287_p3 }
  0x53   : > { %p1290_p4 = pnand %p1289_p7, %p1283_p2 }
  0x55   : > { %1293 = shalt.err (!%p1290_p4)
}
  0x56   : > { %s1294_s30 = scalar_lea.vmem %s1767_s17, 128  ;;  %s1568_s12 = smov [#allocation5]  }
  0x57   : > { %p1295_p12 = scmp.ne.s32.totalorder %s1767_s17, %s1294_s30  ;;  %s1299_s24 = sshll.u32 %s1568_s12, 4  ;;  %s1300_s24 = int_to_ptr.vmem [resolvable:$false] %s1299_s24 }
  0x58   : > { %s1301_s8 = scalar_lea.vmem %s1300_s24, 256  ;;  %p1302_p11 = scmp.lt.s32.totalorder %s1767_s17, %s1300_s24 }
  0x59   : > { %p1297_p1 = pnand %p1295_p12, %p1775_p0  ;;  %p1303_p13 = scmp.lt.s32.totalorder %s1301_s8, %s1294_s30 }
  0x5b   : > { %p1298_p8 = pneg %p1297_p1  ;;  %p1304_p6 = por %p1303_p13, %p1302_p11 }
  0x5d   : > { %p1305_p10 = pnand %p1304_p6, %p1298_p8 }
  0x5f   : > { %1308 = shalt.err (!%p1305_p10)
}
  0x60   : > { %1189 = dma.hbm_to_vmem [thread:$0]  (!%p1755_p9), %s1764_s15, 128, %s1767_s17, %s1769_s13  }
  0x61   : > { %s1569_s3 = smov [#allocation10]   ;;  %s1570_s14 = smov [#allocation11]  }
  0x62   : > { %s348_s20 = sshll.u32 %s1569_s3, 4  ;;  %s361_s1 = sshll.u32 %s1570_s14, 4  ;;  %s349_s20 = int_to_ptr.vmem [resolvable:$true] %s348_s20  ;;  %s362_s1 = int_to_ptr.vmem [resolvable:$true] %s361_s1 }
  0x63   : > { %s1309_s24 = scalar_lea.hbm %s2071_s4, 512  ;;  %p2131_p8 = scmp.ne.s32.totalorder %s2123_s22, 0 }
  0x64   : > { %p1310_p4 = scmp.ne.s32.totalorder %s2071_s4, %s1309_s24  ;;  %p1316_p7 = scmp.lt.u32.totalorder %s1309_s24, %s2071_s4 }
  0x66   : > { %p1312_p11 = pnand %p1310_p4, %p2131_p8 }
  0x68   : > { %p1313_p13 = pneg %p1312_p11 }
  0x6a   : > { %p1318_p2 = pnand %p1316_p7, %p1313_p13 }
  0x6c   : > { %1321 = shalt.err (!%p1318_p2)
}
  0x6d   : > { %s1322_s17 = scalar_lea.vmem %s349_s20, 512  ;;  %p1330_p1 = scmp.lt.s32.totalorder %s349_s20, %s349_s20 }
  0x6e   : > { %p1323_p3 = scmp.ne.s32.totalorder %s349_s20, %s1322_s17  ;;  %p1331_p6 = scmp.lt.s32.totalorder %s1322_s17, %s1322_s17 }
  0x70   : > { %p1325_p5 = pnand %p1323_p3, %p2131_p8  ;;  %p1332_p10 = por %p1331_p6, %p1330_p1 }
  0x72   : > { %p1326_p12 = pneg %p1325_p5 }
  0x74   : > { %p1333_p9 = pnand %p1332_p10, %p1326_p12 }
  0x76   : > { %1336 = shalt.err (!%p1333_p9)
}
  0x77   : > { %p2132_p4 = scmp.ne.s32.totalorder %s2120_s28, 0  ;;  %s2133_s10 = smov 8  }
  0x78   : > { %s2134_s15 = smov 128   ;;  %s1337_s12 = scalar_lea.hbm %s2072_s5, 512 }
  0x79   : > { %1179 = dma.hbm_to_vmem [thread:$0]  (!%p2132_p4), %s2071_s4, 512, %s349_s20, [#allocation9], %s2134_s15, %s2134_s15, %s2133_s10  }
  0x7a   : > { %p1338_p11 = scmp.ne.s32.totalorder %s2072_s5, %s1337_s12  ;;  %p1344_p7 = scmp.lt.u32.totalorder %s1337_s12, %s2072_s5 }
  0x7c   : > { %p1340_p9 = pnand %p1338_p11, %p2131_p8 }
  0x7e   : > { %p1341_p13 = pneg %p1340_p9 }
  0x80   : > { %p1346_p2 = pnand %p1344_p7, %p1341_p13 }
  0x82   : > { %1349 = shalt.err (!%p1346_p2)
}
  0x83   : > { %s1350_s9 = scalar_lea.vmem %s362_s1, 512  ;;  %p1358_p1 = scmp.lt.s32.totalorder %s362_s1, %s362_s1 }
  0x84   : > { %p1351_p3 = scmp.ne.s32.totalorder %s362_s1, %s1350_s9  ;;  %p1359_p6 = scmp.lt.s32.totalorder %s1350_s9, %s1350_s9 }
  0x86   : > { %p1353_p5 = pnand %p1351_p3, %p2131_p8  ;;  %p1360_p10 = por %p1359_p6, %p1358_p1 }
  0x88   : > { %p1354_p12 = pneg %p1353_p5 }
  0x8a   : > { %p1361_p0 = pnand %p1360_p10, %p1354_p12 }
  0x8c   : > { %1364 = shalt.err (!%p1361_p0)
}
  0x8d   : > { %1182 = dma.hbm_to_vmem [thread:$0]  (!%p2132_p4), %s2072_s5, 512, %s362_s1, [#allocation12], %s2134_s15, %s2134_s15, %s2133_s10  }
  0x8e   : > { %s1845_s14 = scalar_lea.hbm %s2067_s0, %s1749_s29  ;;  %s388_s28 = scalar_lea.vmem [#allocation2], %s1753_s11 }
  0x8f   : > { %s395_s12 = sshll.u32 %s388_s28, 4  ;;  %s1854_s8 = scalar_lea.hbm %s2069_s2, %s1749_s29  ;;  %s1848_s12 = int_to_ptr.vmem [resolvable:$true] %s395_s12 }
  0x90   : > { %s2135_s17 = sand.u32 1, %s1559_s19   ;;  %s1365_s10 = scalar_lea.hbm %s1845_s14, 128 }
  0x91   : > { %s385_s1 = scalar_lea.sflag [#allocation3], %s2135_s17  ;;  %p1366_p0 = scmp.ne.s32.totalorder %s1845_s14, %s1365_s10 }
  0x92   : > { %p2136_p8 = scmp.ne.s32.totalorder %s2130_s16, 0  ;;  %s1370_s20 = scalar_lea.hbm %s2067_s0, 256 }
  0x93   : > { %p1371_p9 = scmp.lt.u32.totalorder %s1845_s14, %s2067_s0  ;;  %p1372_p13 = scmp.lt.u32.totalorder %s1370_s20, %s1365_s10 }
  0x94   : > { %p1368_p4 = pnand %p1366_p0, %p2136_p8  ;;  %p1374_p2 = scmp.lt.u32.totalorder %s1365_s10, %s1845_s14 }
  0x95   : > { %p1373_p7 = por %p1372_p13, %p1371_p9 }
  0x96   : > { %p1369_p11 = pneg %p1368_p4 }
  0x97   : > { %p1375_p3 = por %p1374_p2, %p1373_p7 }
  0x99   : > { %p1376_p5 = pnand %p1375_p3, %p1369_p11 }
  0x9b   : > { %1379 = shalt.err (!%p1376_p5)
}
  0x9c   : > { %s1380_s29 = scalar_lea.vmem %s1848_s12, 128  ;;  %s1571_s3 = smov [#allocation2]  }
  0x9d   : > { %p1381_p12 = scmp.ne.s32.totalorder %s1848_s12, %s1380_s29  ;;  %s1385_s28 = sshll.u32 %s1571_s3, 4  ;;  %s1386_s28 = int_to_ptr.vmem [resolvable:$false] %s1385_s28 }
  0x9e   : > { %s1387_s24 = scalar_lea.vmem %s1386_s28, 256  ;;  %p1388_p10 = scmp.lt.s32.totalorder %s1848_s12, %s1386_s28 }
  0x9f   : > { %p1383_p1 = pnand %p1381_p12, %p2136_p8  ;;  %p1389_p0 = scmp.lt.s32.totalorder %s1387_s24, %s1380_s29 }
  0xa1   : > { %p1384_p6 = pneg %p1383_p1  ;;  %p1390_p4 = por %p1389_p0, %p1388_p10 }
  0xa3   : > { %p1391_p9 = pnand %p1390_p4, %p1384_p6 }
  0xa5   : > { %1394 = shalt.err (!%p1391_p9)
}
  0xa6   : > { %p2137_p11 = scmp.ne.s32.totalorder %s2128_s27, 0  ;;  %s424_s30 = scalar_lea.vmem [#allocation7], %s1753_s11 }
  0xa7   : > { %s431_s17 = sshll.u32 %s424_s30, 4  ;;  %s1395_s10 = scalar_lea.hbm %s1854_s8, 128  ;;  %s432_s17 = int_to_ptr.vmem [resolvable:$true] %s431_s17 }
  0xa8   : > { %1186 = dma.hbm_to_vmem [thread:$0]  (!%p2137_p11), %s1845_s14, 128, %s1848_s12, %s385_s1  }
  0xa9   : > { %p1396_p13 = scmp.ne.s32.totalorder %s1854_s8, %s1395_s10  ;;  %s1400_s20 = scalar_lea.hbm %s2069_s2, 256 }
  0xaa   : > { %p1401_p3 = scmp.lt.u32.totalorder %s1854_s8, %s2069_s2  ;;  %p1402_p5 = scmp.lt.u32.totalorder %s1400_s20, %s1395_s10 }
  0xab   : > { %p1398_p7 = pnand %p1396_p13, %p2136_p8  ;;  %p1404_p1 = scmp.lt.u32.totalorder %s1395_s10, %s1854_s8 }
  0xac   : > { %p1403_p12 = por %p1402_p5, %p1401_p3 }
  0xad   : > { %p1399_p2 = pneg %p1398_p7 }
  0xae   : > { %p1405_p6 = por %p1404_p1, %p1403_p12 }
  0xb0   : > { %p1406_p10 = pnand %p1405_p6, %p1399_p2 }
  0xb2   : > { %1409 = shalt.err (!%p1406_p10)
}
  0xb3   : > { %s1410_s11 = scalar_lea.vmem %s432_s17, 128  ;;  %s1572_s14 = smov [#allocation7]  }
  0xb4   : > { %p1411_p0 = scmp.ne.s32.totalorder %s432_s17, %s1410_s11  ;;  %s1415_s12 = sshll.u32 %s1572_s14, 4  ;;  %s1416_s12 = int_to_ptr.vmem [resolvable:$false] %s1415_s12 }
  0xb5   : > { %s1417_s1 = scalar_lea.vmem %s1416_s12, 256  ;;  %p1418_p13 = scmp.lt.s32.totalorder %s432_s17, %s1416_s12 }
  0xb6   : > { %p1413_p4 = pnand %p1411_p0, %p2136_p8  ;;  %p1419_p7 = scmp.lt.s32.totalorder %s1417_s1, %s1410_s11 }
  0xb8   : > { %p1414_p9 = pneg %p1413_p4  ;;  %p1420_p11 = por %p1419_p7, %p1418_p13 }
  0xba   : > { %p1421_p3 = pnand %p1420_p11, %p1414_p9 }
  0xbc   : > { %1424 = shalt.err (!%p1421_p3)
}
  0xbd   : > { %p2138_p5 = scmp.ne.s32.totalorder %s2128_s27, 0  ;;  %p2139_p2 = scmp.ne.s32.totalorder %s2119_s25, 0 }
  0xbe   : > { %s1901_s16 = sand.u32 (!%p2139_p2), 1, %s1555_s18   ;;  %p2140_p8 = scmp.ne.s32.totalorder (!%p2139_p2), %s2116_s23, 0 }
  0xbf   : > { %1192 = dma.hbm_to_vmem [thread:$0]  (!%p2138_p5), %s1854_s8, 128, %s432_s17, %s1769_s13  }
  0xc0   : > { %440 = sbr.rel (%p2139_p2) target bundleno = 497 (0x1f1), region = 56  ;;  %s1904_s29 = sshll.u32 (!%p2139_p2), %s1901_s16, 3 }
  0xc1   : > { %s443_s3 = scalar_lea.sflag (!%p2139_p2), [#allocation3], %s1901_s16  ;;  %s446_s28 = scalar_lea.vmem (!%p2139_p2), [#allocation2], %s1904_s29 }
  0xc7   : > { %1526 = dma.done.wait (%p2140_p8), %s443_s3, 128  }
  0xc8   : > { %1528 = vsyncadd (%p2140_p8), %s443_s3, 4294967168  ;;  %s451_s25 = sand.u32 1, %s1660_s21   ;;  %s455_s27 = scalar_lea.vmem [#allocation5], %s1904_s29 }
  0xc9   : > { %s452_s13 = scalar_lea.sflag [#allocation6], %s451_s25 }
  0xca   : > { %1530 = dma.done.wait (%p2140_p8), %s452_s13, 256  }
  0xcb   : > { %1532 = vsyncadd (%p2140_p8), %s452_s13, 4294967040  ;;  %s464_s8 = scalar_lea.vmem [#allocation7], %s1904_s29  ;;  %p2141_p11 = scmp.eq.s32.totalorder %s1660_s21, 0 }
  0xcd   : > { %1534 = dma.done.wait (%p2141_p11), [#allocation9], 1024   ;;  %p2142_p12 = pmov %p2141_p11 }
  0xce   : > { %p2143_p1 = pmov %p2141_p11 }
  0xcf   : > { %1536 = vsyncadd (%p2142_p12), [#allocation9], 4294966272 }
  0xd0   : > { %1538 = dma.done.wait (%p2143_p1), [#allocation12], 512   ;;  %p2144_p6 = pmov %p2143_p1 }
  0xd1   : > { %v1573_v0 = vmov 0.0|0.0   ;;  %vm1574_vm0 = vmmov 0   ;;  %v1575_v1 = vmov 0.0   ;;  %v536_v2 = vld [vmem:[#allocation8] sm:$0xff]  ;;  %v537_v3 = vld [vmem:[#allocation8 + $0x8] sm:$0xff]  ;;  %v538_v4 = vld [vmem:[#allocation8 + $0x10] sm:$0xff] }
  0xd2   : > { %1540 = vsyncadd (%p2144_p6), [#allocation12], 4294966784  ;;  %1131 = vmatprep.subr.bf16.mxu0 %v1573_v0  ;;  %1137 = vmatprep.subr.bf16.mxu1 %v1573_v0  ;;  %v1132_v5 = vpack.c.bf16 %v537_v3, %v536_v2  ;;  %v539_v6 = vld [vmem:[#allocation8 + $0x18] sm:$0xff]  ;;  %v623_v7 = vld [vmem:[#allocation10] sm:$0xff]  ;;  %vm547_vm1 = vcmask 261120   ;;  %s1945_s30 = sshll.u32 %s1660_s21, 7 }
  0xd3   : > { %1106 = vmatprep.mubr.msk.f32.mxu0 %vm1574_vm0, %v1575_v1  ;;  %1117 = vmatprep.mubr.msk.f32.mxu1 %vm1574_vm0, %v1575_v1  ;;  %v624_v8 = vld [vmem:[#allocation10 + $0x8] sm:$0xff]  ;;  %v1135_v10 = vpack.c.bf16 %v539_v6, %v538_v4  ;;  %v625_v11 = vld [vmem:[#allocation10 + $0x10] sm:$0xff]  ;;  %v626_v12 = vld [vmem:[#allocation10 + $0x18] sm:$0xff]  ;;  %s520_s17 = scalar_lea.vmem [#allocation13], %s1904_s29  ;;  %s527_s20 = scalar_lea.vmem [#allocation14], %s1904_s29 }
  0xd4   : > { %v1138_v9 = vpack.c.bf16 %v624_v8, %v623_v7  ;;  %1133 = vmatpush3.bf16.msra.mxu0 %v1132_v5  ;;  %v709_v13 = vld [vmem:[#allocation11] sm:$0xff]  ;;  %v710_v14 = vld [vmem:[#allocation11 + $0x8] sm:$0xff]  ;;  %v1141_v15 = vpack.c.bf16 %v626_v12, %v625_v11  ;;  %v535_v16 = vld [vmem:[%s446_s28] sm:$0xff]  ;;  %s818_s10 = sshll.u32 %s520_s17, 4  ;;  %s831_s26 = sshll.u32 %s527_s20, 4  ;;  %s1958_s10 = int_to_ptr.vmem [resolvable:$true] %s818_s10  ;;  %s1966_s26 = int_to_ptr.vmem [resolvable:$true] %s831_s26 }
  0xd5   : > { %1134 = vmatprep.subr.bf16.mxu0 %v1573_v0  ;;  %v1144_v17 = vpack.c.bf16 %v710_v14, %v709_v13  ;;  %v711_v18 = vld [vmem:[#allocation11 + $0x10] sm:$0xff]  ;;  %v712_v19 = vld [vmem:[#allocation11 + $0x18] sm:$0xff]  ;;  %v622_v20 = vld [vmem:[%s455_s27] sm:$0xff]  ;;  %s2145_s22 = sld [smem:[#allocation28_spill]]  ;;  %s2147_s13 = sld [smem:[#allocation33_spill]] }
  0xd6   : > { %1139 = vmatpush3.bf16.msra.mxu1 %v1138_v9  ;;  %v1147_v21 = vpack.c.bf16 %v712_v19, %v711_v18  ;;  %v708_v22 = vld [vmem:[%s464_s8] sm:$0xff]  ;;  %s2146_s12 = sld [smem:[#allocation32_spill]]  ;;  %s795_s8 = scalar_lea.sflag [#allocation4], %s1901_s16 }
  0xd7   : > { %1140 = vmatprep.subr.bf16.mxu1 %v1573_v0  ;;  %v1069_v23 = vld [vmem:[%s2073_s6] ss:$0 sm:$0xff]  ;;  %s1425_s23 = scalar_lea.vmem %s1958_s10, 128  ;;  %s1576_s24 = smov [#allocation13]  }
  0xd8   : > { %1136 = vmatpush3.bf16.msra.mxu0 %v1135_v10  ;;  %v1071_v24 = vld [vmem:[%s2074_s7] ss:$0 sm:$0xff]  ;;  %p1426_p10 = scmp.ne.s32.totalorder %s1958_s10, %s1425_s23  ;;  %s1429_s15 = sshll.u32 %s1576_s24, 4  ;;  %s1430_s15 = int_to_ptr.vmem [resolvable:$false] %s1429_s15 }
  0xd9   : > { %1143 = vmatprep.subr.bf16.mxu0 %v1573_v0  ;;  %s1431_s9 = scalar_lea.vmem %s1430_s15, 256  ;;  %p1432_p13 = scmp.lt.s32.totalorder %s1958_s10, %s1430_s15 }
  0xda   : > { %1142 = vmatpush3.bf16.msra.mxu1 %v1141_v15  ;;  %p1433_p7 = scmp.lt.s32.totalorder %s1431_s9, %s1425_s23 }
  0xdb   : > { %1107 = vmatmul.mubr.msk.f32.vlgmr.msra.gmra.mrb[0].mxu0 %vm547_vm1, %v535_v16  ;;  %s1964_s27 = scalar_lea.hbm %s2147_s13, %s1945_s30  ;;  %p2148_p0 = scmp.ne.s32.totalorder %s2145_s22, 0 }
  0xdc   : > { %1145 = vmatpush3.bf16.msra.mxu0 %v1144_v17  ;;  %1128 = vmatprep.mubr.msk.f32.mxu0 %vm1574_vm0, %v1575_v1  ;;  %s1956_s1 = scalar_lea.hbm %s2146_s12, %s1945_s30  ;;  %p1434_p3 = por %p1433_p7, %p1432_p13 }
  0xdd   : > { %1118 = vmatmul.mubr.msk.f32.vlgmr.msra.gmra.mrb[0].mxu1 %vm547_vm1, %v622_v20  ;;  %1146 = vmatprep.subr.bf16.mxu0 %v1573_v0  ;;  %p1427_p4 = pnand %p1426_p10, %p2148_p0 }
  0xdf   : > { %p1428_p9 = pneg %p1427_p4 }
  0xe0   : > { %1148 = vmatpush3.bf16.msra.mxu0 %v1147_v21 }
  0xe1   : > { %p1435_p5 = pnand %p1434_p3, %p1428_p9 }
  0xe3   : > { %1129 = vmatmul.mubr.msk.f32.vlgmr.msra.gmra.mrb[2].mxu0 %vm547_vm1, %v708_v22 }
 0x1ae   : > { %v617_v25 = vpop.f32.mrb[0].mxu0 }
 0x1af   : > { %v618_v26 = vadd.f32 %v1069_v23, %v617_v25  ;;  %v1108_v27 = vpop.f32.mrb[1].mxu0 }
 0x1b0   : > { %v703_v28 = vpop.f32.mrb[0].mxu1 }
 0x1b1   : > { %v704_v29 = vadd.f32 %v1071_v24, %v703_v28  ;;  %v1119_v30 = vpop.f32.mrb[1].mxu1  ;;  %621 = vst.msk [vmem:[%s520_s17] sm:$0xff] %vm547_vm1, %v618_v26 }
 0x1b3   : > { %707 = vst.msk [vmem:[%s527_s20] sm:$0xff] %vm547_vm1, %v704_v29 }
 0x1b4   : > { %1438 = shalt.err (!%p1435_p5)
}
 0x1b5   : > { %s1439_s16 = scalar_lea.hbm %s1956_s1, 128  ;;  %s1443_s11 = scalar_lea.hbm %s2146_s12, 256 }
 0x1b6   : > { %p1440_p2 = scmp.ne.s32.totalorder %s1956_s1, %s1439_s16  ;;  %p1444_p12 = scmp.lt.u32.totalorder %s1956_s1, %s2146_s12 }
 0x1b7   : > { %p1445_p1 = scmp.lt.u32.totalorder %s1443_s11, %s1439_s16  ;;  %p1447_p10 = scmp.lt.u32.totalorder %s1439_s16, %s1956_s1 }
 0x1b8   : > { %p1441_p8 = pnand %p1440_p2, %p2148_p0 }
 0x1b9   : > { %p1446_p6 = por %p1445_p1, %p1444_p12 }
 0x1ba   : > { %p1442_p11 = pneg %p1441_p8 }
 0x1bb   : > { %p1448_p4 = por %p1447_p10, %p1446_p6 }
 0x1bd   : > { %p1449_p9 = pnand %p1448_p4, %p1442_p11 }
 0x1bf   : > { %1452 = shalt.err (!%p1449_p9)
}
 0x1c0   : > { %1167 = dma.vmem_to_hbm [thread:$0]  (%p2148_p0), %s1958_s10, 128, %s1956_s1, %s795_s8  }
 0x1c1   : > { %s1994_s28 = scalar_lea.sflag [#allocation15], %s451_s25  ;;  %s1453_s23 = scalar_lea.vmem %s1966_s26, 128 }
 0x1c2   : > { %p1454_p13 = scmp.ne.s32.totalorder %s1966_s26, %s1453_s23  ;;  %s1577_s24 = smov [#allocation14]  }
 0x1c3   : > { %s1457_s15 = sshll.u32 %s1577_s24, 4  ;;  %s1458_s15 = int_to_ptr.vmem [resolvable:$false] %s1457_s15 }
 0x1c4   : > { %p1455_p7 = pnand %p1454_p13, %p2148_p0  ;;  %s1459_s9 = scalar_lea.vmem %s1458_s15, 256 }
 0x1c5   : > { %p1460_p5 = scmp.lt.s32.totalorder %s1966_s26, %s1458_s15  ;;  %p1461_p2 = scmp.lt.s32.totalorder %s1459_s9, %s1453_s23 }
 0x1c6   : > { %p1456_p3 = pneg %p1455_p7 }
 0x1c7   : > { %p1462_p8 = por %p1461_p2, %p1460_p5 }
 0x1c9   : > { %p1463_p11 = pnand %p1462_p8, %p1456_p3 }
 0x1cb   : > { %1466 = shalt.err (!%p1463_p11)
}
 0x1cc   : > { %s1467_s21 = scalar_lea.hbm %s1964_s27, 128  ;;  %s1471_s1 = scalar_lea.hbm %s2147_s13, 256 }
 0x1cd   : > { %p1468_p12 = scmp.ne.s32.totalorder %s1964_s27, %s1467_s21  ;;  %p1472_p10 = scmp.lt.u32.totalorder %s1964_s27, %s2147_s13 }
 0x1ce   : > { %p1473_p4 = scmp.lt.u32.totalorder %s1471_s1, %s1467_s21  ;;  %p1475_p13 = scmp.lt.u32.totalorder %s1467_s21, %s1964_s27 }
 0x1cf   : > { %p1469_p1 = pnand %p1468_p12, %p2148_p0 }
 0x1d0   : > { %p1474_p9 = por %p1473_p4, %p1472_p10 }
 0x1d1   : > { %p1470_p6 = pneg %p1469_p1 }
 0x1d2   : > { %p1476_p7 = por %p1475_p13, %p1474_p9 }
 0x1d4   : > { %p1477_p3 = pnand %p1476_p7, %p1470_p6 }
 0x1d6   : > { %1480 = shalt.err (!%p1477_p3)
}
 0x1d7   : > { %1168 = dma.vmem_to_hbm [thread:$0]  (%p2148_p0), %s1966_s26, 128, %s1964_s27, %s1994_s28   ;;  %v789_v32 = vpop.f32.mrb[2].mxu0 }
 0x1d8   : > { %s2149_s11 = sld [smem:[#allocation31_spill]]  ;;  %s534_s14 = scalar_lea.vmem [#allocation16], %s1904_s29  ;;  %v1130_v34 = vpop.f32.mrb[3].mxu0 }
 0x1d9   : > { %s844_s3 = sshll.u32 %s534_s14, 4  ;;  %s2150_s15 = sld [smem:[#allocation34_spill]]  ;;  %s845_s3 = int_to_ptr.vmem [resolvable:$true] %s844_s3 }
 0x1da   : > { %s1481_s21 = scalar_lea.vmem %s845_s3, 128  ;;  %s1578_s26 = smov [#allocation16]  }
 0x1db   : > { %p1482_p5 = scmp.ne.s32.totalorder %s845_s3, %s1481_s21  ;;  %s1485_s27 = sshll.u32 %s1578_s26, 4  ;;  %s1486_s27 = int_to_ptr.vmem [resolvable:$false] %s1485_s27 }
 0x1dc   : > { %s1487_s29 = scalar_lea.vmem %s1486_s27, 256  ;;  %p1488_p11 = scmp.lt.s32.totalorder %s845_s3, %s1486_s27 }
 0x1dd   : > { %p1483_p2 = pnand %p1482_p5, %p2148_p0  ;;  %p1489_p12 = scmp.lt.s32.totalorder %s1487_s29, %s1481_s21 }
 0x1de   : > { %v1073_v31 = vld [vmem:[%s2149_s11] ss:$0 sm:$0xff] }
 0x1df   : > { %v790_v33 = vadd.f32 %v1073_v31, %v789_v32  ;;  %s2026_s9 = scalar_lea.hbm %s2150_s15, %s1945_s30  ;;  %p1484_p8 = pneg %p1483_p2 }
 0x1e0   : > { %p1490_p1 = por %p1489_p12, %p1488_p11 }
 0x1e1   : > { %793 = vst.msk [vmem:[%s534_s14] sm:$0xff] %vm547_vm1, %v790_v33 }
 0x1e2   : > { %p1491_p6 = pnand %p1490_p1, %p1484_p8 }
 0x1e4   : > { %1494 = shalt.err (!%p1491_p6)
}
 0x1e5   : > { %s1495_s30 = scalar_lea.hbm %s2026_s9, 128  ;;  %s1499_s1 = scalar_lea.hbm %s2150_s15, 256 }
 0x1e6   : > { %p1496_p10 = scmp.ne.s32.totalorder %s2026_s9, %s1495_s30  ;;  %p1500_p13 = scmp.lt.u32.totalorder %s2026_s9, %s2150_s15 }
 0x1e7   : > { %p1501_p7 = scmp.lt.u32.totalorder %s1499_s1, %s1495_s30  ;;  %p1503_p5 = scmp.lt.u32.totalorder %s1495_s30, %s2026_s9 }
 0x1e8   : > { %p1497_p4 = pnand %p1496_p10, %p2148_p0 }
 0x1e9   : > { %p1502_p3 = por %p1501_p7, %p1500_p13 }
 0x1ea   : > { %p1498_p9 = pneg %p1497_p4 }
 0x1eb   : > { %p1504_p2 = por %p1503_p5, %p1502_p3 }
 0x1ed   : > { %p1505_p8 = pnand %p1504_p2, %p1498_p9 }
 0x1ef   : > { %1508 = shalt.err (!%p1505_p8)
}
 0x1f0   : > { %1169 = dma.vmem_to_hbm [thread:$0]  (%p2148_p0), %s845_s3, 128, %s2026_s9, %s1994_s28  }
 0x1f1 PF: > { %s2151_s17 = sld [smem:[#allocation23_spill]]  ;;  %s2152_s20 = sld [smem:[#allocation25_spill]] }
 0x1f2   : > { %s2153_s11 = sld [smem:[#allocation24_spill]] }
 0x1f7   : > { %s856_s14 = sand.u32 1, %s2151_s17   ;;  %p2154_p11 = scmp.ne.s32.totalorder %s2152_s20, 0 }
 0x1f8   : > { %p2155_p12 = scmp.ge.s32.totalorder %s2153_s11, 2  ;;  %s857_s23 = scalar_lea.sflag [#allocation4], %s856_s14 }
 0x1fa   : > { %p1194_p1 = pnand %p2155_p12, %p2154_p11 }
 0x1fc   : > { %1542 = dma.done.wait (!%p1194_p1), %s857_s23, 128  }
 0x1fd   : > { %1544 = vsyncadd (!%p1194_p1), %s857_s23, 4294967168  ;;  %s2156_s24 = sadd.s32 4294967294, %s2153_s11  }
 0x1fe   : > { %s865_s21 = sand.u32 1, %s2156_s24  }
 0x1ff   : > { %s866_s26 = scalar_lea.sflag [#allocation15], %s865_s21 }
 0x200   : > { %1546 = dma.done.wait (!%p1194_p1), %s866_s26, 256  }
 0x201   : > { %1548 = vsyncadd (!%p1194_p1), %s866_s26, 4294967040  ;;  %s2157_s20 = sld [smem:[#allocation26_spill]]  ;;  %s2158_s22 = sld [smem:[#allocation27_spill]] }
 0x202   : > { %s2159_s17 = smov %s1555_s18  ;;  %s2160_s18 = smov %s1559_s19 }
 0x207   : > { %p33_p0 = scmp.ge.s32.totalorder %s2157_s20, 4   ;;  %s2161_s19 = smov %s2158_s22 }
 0x209   :  { %35 = sbr.rel (!%p33_p0) target bundleno = 18 (0x12), region = 169 }
 0x210   :  { %880 = vsyncpa [#allocation3], 1 }
 0x211   :  { %882 = vsyncpa [#allocation3 + $0x1], 1 }
 0x212   :  { %883 = vsyncpa [#allocation6], 1 }
 0x213   :  { %885 = vsyncpa [#allocation6 + $0x1], 1 }
 0x214   :  { %886 = vsyncpa [#allocation9], 1 }
 0x215   :  { %887 = vsyncpa [#allocation12], 1 }
 0x216   :  { %888 = vsyncpa [#allocation4], 1 }
 0x217   :  { %890 = vsyncpa [#allocation4 + $0x1], 1 }
 0x218   :  { %891 = vsyncpa [#allocation15], 1 }
 0x219   :  { %893 = vsyncpa [#allocation15 + $0x1], 1 }

</bundles_post_ra>
